<compile_context>
chip_gen: v7x
topology: tpu7x:2x2x1
jax: 0.10.0
libtpu: 0.0.40
codegen_flags: <defaults>
</compile_context>

<pallas_src>
import functools

import jax
import jax.numpy as jnp
from jax.experimental import pallas as pl
from jax.experimental.pallas import tpu as pltpu

# ---------------- hyper-parameters (small, consistent with the module) ----------
BATCH      = 2
IN_CH      = 4
SPATIAL    = 16          # width_i == height_i
PATCH_SIZE = 4
OUTPUT_D   = 32

W_BLOCKS   = SPATIAL // PATCH_SIZE            # patches along width
H_BLOCKS   = SPATIAL // PATCH_SIZE            # patches along height
N_PATCHES  = W_BLOCKS * H_BLOCKS              # patches per image
PATCH_DIM  = IN_CH * PATCH_SIZE * PATCH_SIZE  # features per patch


def patch_embed_kernel(p_ref, w_ref, b_ref, o_ref):
    """p_ref: (B*N_PATCHES, PATCH_DIM); w_ref: (PATCH_DIM, D_OUT); b_ref: (1, D_OUT)."""
    o_ref[...] = (
        jnp.dot(p_ref[...], w_ref[...], preferred_element_type=jnp.float32)
        + b_ref[...]
    )


def _patchify(x, patch_size):
    """einops 'b c (w pw) (h ph) -> b (w h) (c pw ph)' as reshape/transpose (0 FLOPs)."""
    B, C, Wi, Hi = x.shape
    w, h = Wi // patch_size, Hi // patch_size
    x = x.reshape(B, C, w, patch_size, h, patch_size)
    x = x.transpose(0, 2, 4, 1, 3, 5)                 # (B, w, h, C, pw, ph)
    return x.reshape(B, w * h, C * patch_size * patch_size)


@functools.partial(jax.jit, static_argnames=("patch_size",))
def patch_embedding(x, weight, bias, *, patch_size):
    """x: (B, C, W, H) f32; weight: (D_OUT, PATCH_DIM); bias: (D_OUT,) — PyTorch Linear layout."""
    B = x.shape[0]
    patches = _patchify(x, patch_size)                # (B, N_PATCHES, PATCH_DIM)
    n_rows = B * patches.shape[1]
    patch_dim = patches.shape[2]
    d_out = weight.shape[0]

    patches2d = patches.reshape(n_rows, patch_dim)    # collapse batch -> single MXU matmul
    w_t = weight.T                                    # (PATCH_DIM, D_OUT): y = p @ W^T
    b2 = bias.reshape(1, d_out)

    out = pl.pallas_call(
        patch_embed_kernel,
        out_shape=jax.ShapeDtypeStruct((n_rows, d_out), jnp.float32),
        grid=(1,),                                    # single grid step: whole problem in VMEM
        in_specs=[
            pl.BlockSpec((n_rows, patch_dim), lambda i: (0, 0)),
            pl.BlockSpec((patch_dim, d_out), lambda i: (0, 0)),
            pl.BlockSpec((1, d_out), lambda i: (0, 0)),
        ],
        out_specs=pl.BlockSpec((n_rows, d_out), lambda i: (0, 0)),
        compiler_params=pltpu.CompilerParams(dimension_semantics=("arbitrary",)),
    )(patches2d, w_t, b2)

    return out.reshape(B, patches.shape[1], d_out)


def _ref_forward(x, weight, bias, patch_size):
    patches = _patchify(x, patch_size)
    return jnp.einsum("bpf,df->bpd", patches, weight) + bias


if __name__ == "__main__":
    key = jax.random.PRNGKey(0)
    k_x, k_w, k_b = jax.random.split(key, 3)
    x = jax.random.normal(k_x, (BATCH, IN_CH, SPATIAL, SPATIAL), jnp.float32)
    # PyTorch nn.Linear default init: U(-1/sqrt(fan_in), 1/sqrt(fan_in))
    bound = 1.0 / (PATCH_DIM ** 0.5)
    weight = jax.random.uniform(k_w, (OUTPUT_D, PATCH_DIM), jnp.float32, -bound, bound)
    bias = jax.random.uniform(k_b, (OUTPUT_D,), jnp.float32, -bound, bound)

    out = patch_embedding(x, weight, bias, patch_size=PATCH_SIZE)
    out = jax.block_until_ready(out)

    assert out.shape == (BATCH, N_PATCHES, OUTPUT_D) and out.dtype == jnp.float32
    assert bool(jnp.all(jnp.isfinite(out)))
    ref = _ref_forward(x, weight, bias, PATCH_SIZE)
    assert bool(jnp.allclose(out, ref, atol=1e-5, rtol=1e-5))
    print("KERNEL_OK")
</pallas_src>

<mosaic_0001>
module attributes {stable_mosaic.version = 11 : i64} {
  func.func @patch_embed_kernel(%arg0: i32, %arg1: memref<32x64xf32, #tpu.memory_space<vmem>>, %arg2: memref<64x32xf32, #tpu.memory_space<vmem>>, %arg3: memref<1x32xf32, #tpu.memory_space<vmem>>, %arg4: memref<32x32xf32, #tpu.memory_space<vmem>>) attributes {dimension_semantics = [#tpu.dimension_semantics<arbitrary>], iteration_bounds = array<i64: 1>, scalar_prefetch = 0 : i64, scratch_operands = 0 : i64, tpu.core_type = #tpu.core_type<tc>, window_params = [{pipeline_mode = #tpu.pipeline_mode<synchronous>, transform_indices = @transform_0, window_bounds = array<i64: 32, 64>}, {pipeline_mode = #tpu.pipeline_mode<synchronous>, transform_indices = @transform_1, window_bounds = array<i64: 64, 32>}, {pipeline_mode = #tpu.pipeline_mode<synchronous>, transform_indices = @transform_2, window_bounds = array<i64: 1, 32>}, {pipeline_mode = #tpu.pipeline_mode<synchronous>, transform_indices = @transform_3, window_bounds = array<i64: 32, 32>}]} {
    %c0 = arith.constant 0 : index
    %c0_0 = arith.constant 0 : index
    %0 = vector.load %arg1[%c0, %c0_0] : memref<32x64xf32, #tpu.memory_space<vmem>>, vector<32x64xf32>
    %c0_1 = arith.constant 0 : index
    %c0_2 = arith.constant 0 : index
    %1 = vector.load %arg2[%c0_1, %c0_2] : memref<64x32xf32, #tpu.memory_space<vmem>>, vector<64x32xf32>
    %cst = arith.constant dense<0.000000e+00> : vector<32x32xf32>
    %2 = tpu.matmul %0, %1, %cst {dimension_numbers = #tpu.dot_dimension_numbers<[1], [0], [0], [1], [0, 0, 1, 1], [], []>} : vector<32x64xf32>, vector<64x32xf32>, vector<32x32xf32> -> vector<32x32xf32>
    %c0_3 = arith.constant 0 : index
    %c0_4 = arith.constant 0 : index
    %3 = vector.load %arg3[%c0_3, %c0_4] : memref<1x32xf32, #tpu.memory_space<vmem>>, vector<1x32xf32>
    %4 = vector.broadcast %3 : vector<1x32xf32> to vector<32x32xf32>
    %5 = arith.addf %2, %4 : vector<32x32xf32>
    %c0_5 = arith.constant 0 : index
    %c0_6 = arith.constant 0 : index
    %6 = vector.load %arg4[%c0_5, %c0_6] : memref<32x32xf32, #tpu.memory_space<vmem>>, vector<32x32xf32>
    tpu.vector_store %arg4[%c0_5, %c0_6], %5 {strides = array<i32>} : memref<32x32xf32, #tpu.memory_space<vmem>>, vector<32x32xf32>,
    return
  }
  func.func @transform_0(%arg0: i32) -> (i32, i32) {
    %c0_i32 = arith.constant 0 : i32
    %c0_i32_0 = arith.constant 0 : i32
    %c0_i32_1 = arith.constant 0 : i32
    return %c0_i32, %c0_i32_0 : i32, i32
  }
  func.func @transform_1(%arg0: i32) -> (i32, i32) {
    %c0_i32 = arith.constant 0 : i32
    %c0_i32_0 = arith.constant 0 : i32
    %c0_i32_1 = arith.constant 0 : i32
    return %c0_i32, %c0_i32_0 : i32, i32
  }
  func.func @transform_2(%arg0: i32) -> (i32, i32) {
    %c0_i32 = arith.constant 0 : i32
    %c0_i32_0 = arith.constant 0 : i32
    %c0_i32_1 = arith.constant 0 : i32
    return %c0_i32, %c0_i32_0 : i32, i32
  }
  func.func @transform_3(%arg0: i32) -> (i32, i32) {
    %c0_i32 = arith.constant 0 : i32
    %c0_i32_0 = arith.constant 0 : i32
    %c0_i32_1 = arith.constant 0 : i32
    return %c0_i32, %c0_i32_0 : i32, i32
  }
}

</mosaic_0001>

<bundles_post_ra>
// kernel: patch_embedding.1
= control target key start
LH: loop header
LB: loop body
LE: loop exit
PB: predicated region body
PF: predicated region fallthrough
CT: control target
= control target key end

     0   :  { %vm34_vm0 = vcmask 523264   ;;  %s321_s0 = inlined_call_operand.vmem [shape: f32[32,64], index: 0, kind: input, shape index: {}]   ;;  %s322_s1 = inlined_call_operand.vmem [shape: f32[64,32], index: 1, kind: input, shape index: {}]   ;;  %s323_s2 = inlined_call_operand.vmem [shape: f32[1,32], index: 2, kind: input, shape index: {}]   ;;  %s324_s3 = inlined_call_operand.hbm [shape: f32[32,32], index: 3, kind: output, shape index: {}]  }
   0x1   :  { %v19_v0 = vld [vmem:[%s322_s1] sm:$0xff]  ;;  %v20_v1 = vld [vmem:[%s322_s1 + $0x8] sm:$0xff]  ;;  %v21_v2 = vld [vmem:[%s322_s1 + $0x10] sm:$0xff] }
   0x2   :  { %v192_v3 = vpack.c.bf16 %v20_v1, %v19_v0  ;;  %v22_v4 = vld [vmem:[%s322_s1 + $0x18] sm:$0xff]  ;;  %v23_v6 = vld [vmem:[%s322_s1 + $0x20] sm:$0xff]  ;;  %v24_v7 = vld [vmem:[%s322_s1 + $0x28] sm:$0xff] }
   0x3   :  { %v196_v5 = vpack.c.bf16 %v22_v4, %v21_v2  ;;  %v15_v8 = vld [vmem:[%s321_s0] sm:$0xff]  ;;  %v17_v9 = vld [vmem:[%s321_s0 + $0x10] sm:$0xff] }
   0x4   :  { %193 = vmatprep.subr.bf16.mxu0 %v192_v3  ;;  %208 = vmatprep.subr.bf16.mxu1 %v192_v3 }
   0x5   :  { %195 = vmatpush3.bf16.msra.mxu0 %v192_v3  ;;  %212 = vmatpush3.bf16.msra.mxu1 %v192_v3 }
   0x6   :  { %8 = vsyncpa [#allocation3], 0  ;;  %197 = vmatprep.subr.bf16.mxu0 %v196_v5  ;;  %209 = vmatprep.subr.bf16.mxu1 %v196_v5  ;;  %v200_v10 = vpack.c.bf16 %v24_v7, %v23_v6  ;;  %v25_v11 = vld [vmem:[%s322_s1 + $0x30] sm:$0xff]  ;;  %v26_v12 = vld [vmem:[%s322_s1 + $0x38] sm:$0xff]  ;;  %s243_s10 = smov [#allocation2]   ;;  %vm132_vm1 = vcmask 261120  }
   0x7   :  { %186 = vmatprep.mubr.msk.f32.mxu0 %vm34_vm0, %v15_v8  ;;  %189 = vmatprep.mubr.msk.f32.mxu1 %vm34_vm0, %v17_v9  ;;  %v204_v13 = vpack.c.bf16 %v26_v12, %v25_v11  ;;  %v16_v14 = vld [vmem:[%s321_s0 + $0x8] sm:$0xff]  ;;  %v18_v15 = vld [vmem:[%s321_s0 + $0x18] sm:$0xff]  ;;  %v153_v16 = vld [vmem:[%s323_s2] ss:$0 sm:$0xff]  ;;  %s142_s11 = sshll.u32 %s243_s10, 4  ;;  %s143_s11 = int_to_ptr.vmem [resolvable:$true] %s142_s11 }
   0x8   :  { %s219_s0 = scalar_lea.vmem %s143_s11, 512  ;;  %p224_p1 = scmp.lt.s32.totalorder %s143_s11, %s143_s11 }
   0x9   :  { %199 = vmatpush3.bf16.msra.mxu0 %v196_v5  ;;  %213 = vmatpush3.bf16.msra.mxu1 %v196_v5  ;;  %p220_p0 = scmp.ne.s32.totalorder %s143_s11, %s219_s0  ;;  %p225_p2 = scmp.lt.s32.totalorder %s219_s0, %s219_s0 }
   0xa   :  { %201 = vmatprep.subr.bf16.mxu0 %v200_v10  ;;  %210 = vmatprep.subr.bf16.mxu1 %v200_v10 }
   0xb   :  { %p226_p3 = por %p225_p2, %p224_p1 }
   0xd   :  { %203 = vmatpush3.bf16.msra.mxu0 %v200_v10  ;;  %214 = vmatpush3.bf16.msra.mxu1 %v200_v10  ;;  %p227_p4 = pnand %p226_p3, %p220_p0 }
   0xe   :  { %205 = vmatprep.subr.bf16.mxu0 %v204_v13  ;;  %211 = vmatprep.subr.bf16.mxu1 %v204_v13 }
  0x11   :  { %207 = vmatpush3.bf16.msra.mxu0 %v204_v13  ;;  %215 = vmatpush3.bf16.msra.mxu1 %v204_v13 }
  0x14   :  { %187 = vmatmul.mubr.msk.f32.vlgmr.msra.gmra.mrb[0].mxu0 %vm34_vm0, %v16_v14  ;;  %190 = vmatmul.mubr.msk.f32.vlgmr.msra.gmra.mrb[0].mxu1 %vm34_vm0, %v18_v15 }
  0xe7   :  { %v188_v17 = vpop.f32.mrb[0].mxu0  ;;  %v191_v18 = vpop.f32.mrb[0].mxu1 }
  0xe8   :  { %v119_v19 = vadd.f32 %v188_v17, %v153_v16  ;;  %v129_v20 = vadd.f32 %v191_v18, %v153_v16  ;;  %v113_v21 = vpop.f32.mrb[1].mxu0  ;;  %v123_v22 = vpop.f32.mrb[1].mxu1 }
  0xe9   :  { %v114_v23 = vadd.f32 %v153_v16, %v113_v21  ;;  %v124_v24 = vadd.f32 %v153_v16, %v123_v22 }
  0xea   :  { %134 = vst.msk [vmem:[#allocation2 + $0x8] sm:$0xff] %vm132_vm1, %v119_v19  ;;  %136 = vst.msk [vmem:[#allocation2 + $0x18] sm:$0xff] %vm132_vm1, %v129_v20 }
  0xeb   :  { %133 = vst.msk [vmem:[#allocation2] sm:$0xff] %vm132_vm1, %v114_v23  ;;  %135 = vst.msk [vmem:[#allocation2 + $0x10] sm:$0xff] %vm132_vm1, %v124_v24 }
  0xec   :  { %230 = shalt.err (!%p227_p4)
}
  0xed   :  { %s231_s13 = scalar_lea.hbm %s324_s3, 512 }
  0xee   :  { %p232_p5 = scmp.ne.s32.totalorder %s324_s3, %s231_s13  ;;  %p235_p6 = scmp.lt.u32.totalorder %s231_s13, %s324_s3 }
  0xf0   :  { %p237_p7 = pnand %p235_p6, %p232_p5 }
  0xf2   :  { %240 = shalt.err (!%p237_p7)
}
  0xf3   :  { %s244_s18 = smov 128   ;;  %s245_s19 = smov 8  }
  0xf4   :  { %148 = dma.vmem_to_hbm [thread:$0]  %s143_s11, 512, %s324_s3, [#allocation3], %s244_s18, %s244_s18, %s245_s19  }
  0xf5   :  { %241 = dma.done.wait [#allocation3], 512  }
  0xf6   :  { %242 = vsyncadd [#allocation3], 4294966784 }
  0xf7   :  { %152 = vsyncpa [#allocation3], 1 }

</bundles_post_ra>
